<compile_context>
chip_gen: v5e
topology: v5e:2x2
jax: 0.10.0
libtpu: 0.0.40
codegen_flags: <defaults>
</compile_context>

<pallas_src>
import functools

import jax
import jax.numpy as jnp
from jax.experimental import pallas as pl
from jax.experimental.pallas import tpu as pltpu

COS_EPS = 1e-8       # torch.nn.CosineSimilarity default eps
MAX_NORM = 5.0       # Embedding(max_norm=5)
PADDING_IDX = 1      # Embedding(padding_idx=1)


def kvmem_kernel(q_ref, mk_ref, mv_ref, w_ref, x_ref, *, pack):
    # Per-step tiles (B = batch block):
    #   q_ref  (B, E)       mk_ref (B, Mk, E)    mv_ref (B, Mk, E)
    #   w_ref  (E, E)       x_ref  (B // pack, pack * E)
    q = q_ref[...].astype(jnp.float32)           # (B, E)
    mk = mk_ref[...].astype(jnp.float32)         # (B, Mk, E)
    mv = mv_ref[...].astype(jnp.float32)         # (B, Mk, E)

    # Cosine similarity with the memory axis on lanes -> (B, Mk).
    dots = jnp.sum(mk * q[:, None, :], axis=-1)                      # (B, Mk)
    q_nrm = jnp.sqrt(jnp.sum(q * q, axis=-1, keepdims=True))         # (B, 1)
    mk_nrm = jnp.sqrt(jnp.sum(mk * mk, axis=-1))                     # (B, Mk)
    # Modern torch.nn.CosineSimilarity clamps each norm with eps separately.
    sim = dots / (jnp.maximum(q_nrm, COS_EPS) * jnp.maximum(mk_nrm, COS_EPS))

    # Softmax over the memory axis (lane-dense reduction).
    m = jnp.max(sim, axis=-1, keepdims=True)
    p = jnp.exp(sim - m)
    p = p / jnp.sum(p, axis=-1, keepdims=True)                       # (B, Mk)

    # value_reading = softmax @ memory_values_embedding -> (B, E).
    # Broadcast-multiply + reduce is fine at small Mk/E; switch to a batched
    # lax.dot_general ('bm,bme->be') if Mk/E grow beyond toy sizes.
    value_reading = jnp.sum(p[:, :, None] * mv, axis=1)              # (B, E)

    # result = Linear(E, E, bias=False)(value_reading) == v @ W^T.
    # One MXU matmul per grid step with f32 accumulation (native bf16 path
    # when input_dtype=bf16).
    result = jax.lax.dot_general(
        value_reading.astype(w_ref.dtype), w_ref[...],
        dimension_numbers=(((1,), (1,)), ((), ())),
        preferred_element_type=jnp.float32)                          # (B, E)

    b, e = result.shape
    # Lane-dense store: fold `pack` batch rows into one >=128-lane row.
    x_ref[...] = result.reshape(b // pack, pack * e).astype(x_ref.dtype)


def _renormalize_table(table):
    """nn.Embedding(max_norm=5) lookup-time renorm, hoisted once per table."""
    norms = jnp.linalg.norm(table, axis=-1, keepdims=True)
    scale = jnp.where(norms > MAX_NORM, MAX_NORM / (norms + 1e-7), 1.0)
    return table * scale


def _encode(table, tokens, mean_axis):
    """Encoder.forward: embedding lookup + mean over the token axis (XLA glue,
    so only compact (..., E) encodings — not (..., D, E) tensors — hit HBM)."""
    return jnp.mean(jnp.take(table, tokens, axis=0), axis=mean_axis)


def _cdiv(a, b):
    return -(-a // b)


def _choose_batch_block(n, target):
    """Sublane-aligned batch block; prefers a grid of length >= 2 (even when
    cheaply possible) so both v7x TensorCores get work."""
    if n <= 8:
        return n                                 # block == full array: legal
    b = max(8, (min(int(target), n) // 8) * 8)   # multiple of 8 (sublanes)
    if _cdiv(n, b) < 2:                          # keep >= 2 grid steps
        b = max(8, (b // 16) * 8)
    g = _cdiv(n, b)
    if g > 1 and g % 2 == 1:                     # try to even out the grid
        b_alt = max(8, (_cdiv(n, g + 1) // 8) * 8)
        if _cdiv(n, b_alt) % 2 == 0:
            b = b_alt
    return b


def _choose_lane_pack(b_blk, n_pad, e):
    """Fold `pack` batch rows into one output row so the store is >=128 lanes,
    but only when the resulting block stays (8,128)-legal."""
    if e >= 128 or 128 % e != 0:
        return 1
    pack = 128 // e
    if b_blk % pack != 0:
        return 1
    rows = b_blk // pack
    if rows % 8 == 0 or b_blk == n_pad:
        return pack
    return 1


def _vmem_limit_bytes(b_blk, mk, e, in_itemsize):
    per_step_in = (b_blk * e + 2 * b_blk * mk * e) * in_itemsize   # q + mk + mv
    per_step_out = b_blk * e * 4                                   # f32 result
    need = 2 * (per_step_in + per_step_out) + e * e * in_itemsize + (8 << 20)
    # At least the scoped default, never above v7x's 64 MiB physical VMEM.
    return int(min(64 << 20, max(32 << 20, need)))


@functools.partial(jax.jit, static_argnames=("batch_block", "input_dtype"))
def kv_memory_net_forward(params, query, response, memory_keys,
                          memory_values, candidates, *,
                          batch_block=256, input_dtype=jnp.float32):
    # Hoisted once per table (was recomputed per encoder call).
    emb_in = _renormalize_table(params["emb_in"])
    emb_out = _renormalize_table(params["emb_out"])

    # Encoder outputs (gather + token-mean fused in XLA).
    q_enc = _encode(emb_in, query, mean_axis=1)            # (N, E)
    mk_enc = _encode(emb_in, memory_keys, mean_axis=2)     # (N, Mk, E)
    mv_enc = _encode(emb_in, memory_values, mean_axis=2)   # (N, Mk, E)
    resp_enc = _encode(emb_out, response, mean_axis=1)     # (N, E)
    cand_enc = _encode(emb_out, candidates, mean_axis=2)   # (N, C, E)

    N, E = q_enc.shape
    Mk = mk_enc.shape[1]
    C = cand_enc.shape[1]

    # y_encoded is pure data plumbing -> built in XLA, never enters the kernel:
    # candidates_embedding[:, 0, :] = response_embedding[:, 0, :]  (train time)
    y_enc = cand_enc.at[:, 0, :].set(resp_enc)

    b_blk = _choose_batch_block(N, batch_block)
    n_pad = _cdiv(N, b_blk) * b_blk

    # Cast kernel inputs (set input_dtype=jnp.bfloat16 on v6e/v7x to halve HBM
    # reads; f32 accumulation stays inside the kernel).
    w = params["linear_w"].astype(input_dtype)
    q_in = q_enc.astype(input_dtype)
    mk_in = mk_enc.astype(input_dtype)
    mv_in = mv_enc.astype(input_dtype)

    # Pad only the arrays the kernel actually reads.  Padded rows are zeros ->
    # clamped norms, uniform softmax, zero value reading: no NaNs.
    if n_pad != N:
        pad = n_pad - N
        q_in = jnp.pad(q_in, ((0, pad), (0, 0)))
        mk_in = jnp.pad(mk_in, ((0, pad), (0, 0), (0, 0)))
        mv_in = jnp.pad(mv_in, ((0, pad), (0, 0), (0, 0)))

    pack = _choose_lane_pack(b_blk, n_pad, E)

    grid_spec = pltpu.PrefetchScalarGridSpec(
        num_scalar_prefetch=0,
        grid=(n_pad // b_blk,),
        in_specs=[
            pl.BlockSpec((b_blk, E), lambda b: (b, 0)),            # q
            pl.BlockSpec((b_blk, Mk, E), lambda b: (b, 0, 0)),     # memory keys
            pl.BlockSpec((b_blk, Mk, E), lambda b: (b, 0, 0)),     # memory values
            pl.BlockSpec((E, E), lambda b: (0, 0)),                # linear weight
        ],
        out_specs=pl.BlockSpec((b_blk // pack, pack * E), lambda b: (b, 0)),
    )
    # NOTE: if per-step compute stays tiny at larger shapes, consider
    # pipeline_mode=pl.Buffered(3) on the mk/mv specs after re-budgeting VMEM.

    result_packed = pl.pallas_call(
        functools.partial(kvmem_kernel, pack=pack),
        out_shape=jax.ShapeDtypeStruct((n_pad // pack, pack * E), jnp.float32),
        grid_spec=grid_spec,
        compiler_params=pltpu.CompilerParams(
            dimension_semantics=("parallel",),
            vmem_limit_bytes=_vmem_limit_bytes(
                b_blk, Mk, E, jnp.dtype(input_dtype).itemsize)),
    )(q_in, mk_in, mv_in, w)

    result = result_packed.reshape(n_pad, E)[:N]                   # (N, E)

    # x_encoded = cat([result] * C, dim=1): broadcast outside the kernel so the
    # kernel's HBM write stays (N, E) instead of (N, C, E).
    x_enc = jnp.broadcast_to(result[:, None, :], (N, C, E))
    return x_enc, y_enc


def init_params(key, vocab_size, embedding_dim):
    k1, k2, k3 = jax.random.split(key, 3)
    emb_in = jax.random.normal(k1, (vocab_size, embedding_dim), jnp.float32)
    emb_out = jax.random.normal(k2, (vocab_size, embedding_dim), jnp.float32)
    # padding_idx=1 rows are zero.
    emb_in = emb_in.at[PADDING_IDX].set(0.0)
    emb_out = emb_out.at[PADDING_IDX].set(0.0)
    bound = 1.0 / jnp.sqrt(embedding_dim)
    linear_w = jax.random.uniform(k3, (embedding_dim, embedding_dim),
                                  jnp.float32, -bound, bound)
    return {"emb_in": emb_in, "emb_out": emb_out, "linear_w": linear_w}


if __name__ == "__main__":
    # N batch, M query/response tokens, Mk memories, D memory/candidate tokens,
    # C candidates, E embedding dim.
    N, M, Mk, D, C, E = 16, 8, 4, 8, 6, 32
    VOCAB = 50

    key = jax.random.PRNGKey(0)
    kp, kq, kr, kk, kv, kc = jax.random.split(key, 6)

    params = init_params(kp, VOCAB, E)
    query = jax.random.randint(kq, (N, M), 0, VOCAB, jnp.int32)
    response = jax.random.randint(kr, (N, M), 0, VOCAB, jnp.int32)
    memory_keys = jax.random.randint(kk, (N, Mk, D), 0, VOCAB, jnp.int32)
    memory_values = jax.random.randint(kv, (N, Mk, D), 0, VOCAB, jnp.int32)
    candidates = jax.random.randint(kc, (N, C, D), 0, VOCAB, jnp.int32)

    x_enc, y_enc = kv_memory_net_forward(
        params, query, response, memory_keys, memory_values, candidates)
    jax.block_until_ready((x_enc, y_enc))

    assert x_enc.shape == (N, C, E) and y_enc.shape == (N, C, E)
    assert bool(jnp.all(jnp.isfinite(x_enc))) and bool(jnp.all(jnp.isfinite(y_enc)))
    print("KERNEL_OK")
</pallas_src>

<mosaic_0001>
module attributes {stable_mosaic.version = 11 : i64} {
  func.func @kvmem_kernel(%arg0: i32, %arg1: memref<8x32xf32, #tpu.memory_space<vmem>>, %arg2: memref<8x4x32xf32, #tpu.memory_space<vmem>>, %arg3: memref<8x4x32xf32, #tpu.memory_space<vmem>>, %arg4: memref<32x32xf32, #tpu.memory_space<vmem>>, %arg5: memref<8x32xf32, #tpu.memory_space<vmem>>) attributes {dimension_semantics = [#tpu.dimension_semantics<parallel>], iteration_bounds = array<i64: 2>, scalar_prefetch = 0 : i64, scratch_operands = 0 : i64, tpu.core_type = #tpu.core_type<tc>, window_params = [{transform_indices = @transform_0, window_bounds = array<i64: 8, 32>}, {transform_indices = @transform_1, window_bounds = array<i64: 8, 4, 32>}, {transform_indices = @transform_2, window_bounds = array<i64: 8, 4, 32>}, {pipeline_mode = #tpu.pipeline_mode<synchronous>, transform_indices = @transform_3, window_bounds = array<i64: 32, 32>}, {transform_indices = @transform_4, window_bounds = array<i64: 8, 32>}]} {
    %c0 = arith.constant 0 : index
    %c0_0 = arith.constant 0 : index
    %0 = vector.load %arg1[%c0, %c0_0] : memref<8x32xf32, #tpu.memory_space<vmem>>, vector<8x32xf32>
    %c0_1 = arith.constant 0 : index
    %c0_2 = arith.constant 0 : index
    %c0_3 = arith.constant 0 : index
    %1 = vector.load %arg2[%c0_1, %c0_2, %c0_3] : memref<8x4x32xf32, #tpu.memory_space<vmem>>, vector<8x4x32xf32>
    %c0_4 = arith.constant 0 : index
    %c0_5 = arith.constant 0 : index
    %c0_6 = arith.constant 0 : index
    %2 = vector.load %arg3[%c0_4, %c0_5, %c0_6] : memref<8x4x32xf32, #tpu.memory_space<vmem>>, vector<8x4x32xf32>
    %3 = vector.shape_cast %0 : vector<8x32xf32> to vector<8x1x32xf32>
    %4 = vector.broadcast %3 : vector<8x1x32xf32> to vector<8x4x32xf32>
    %5 = arith.mulf %1, %4 : vector<8x4x32xf32>
    %cst = arith.constant dense<0.000000e+00> : vector<8x4xf32>
    %6 = vector.multi_reduction <add>, %5, %cst [2] : vector<8x4x32xf32> to vector<8x4xf32>
    %7 = arith.mulf %0, %0 : vector<8x32xf32>
    %cst_7 = arith.constant dense<0.000000e+00> : vector<8xf32>
    %8 = vector.multi_reduction <add>, %7, %cst_7 [1] : vector<8x32xf32> to vector<8xf32>
    %9 = vector.shape_cast %8 : vector<8xf32> to vector<8x1xf32>
    %10 = math.sqrt %9 : vector<8x1xf32>
    %11 = arith.mulf %1, %1 : vector<8x4x32xf32>
    %cst_8 = arith.constant dense<0.000000e+00> : vector<8x4xf32>
    %12 = vector.multi_reduction <add>, %11, %cst_8 [2] : vector<8x4x32xf32> to vector<8x4xf32>
    %13 = math.sqrt %12 : vector<8x4xf32>
    %cst_9 = arith.constant 9.99999993E-9 : f32
    %14 = vector.broadcast %cst_9 : f32 to vector<8x1xf32>
    %15 = arith.maximumf %10, %14 : vector<8x1xf32>
    %cst_10 = arith.constant 9.99999993E-9 : f32
    %16 = vector.broadcast %cst_10 : f32 to vector<8x4xf32>
    %17 = arith.maximumf %13, %16 : vector<8x4xf32>
    %18 = vector.broadcast %15 : vector<8x1xf32> to vector<8x4xf32>
    %19 = arith.mulf %18, %17 : vector<8x4xf32>
    %20 = arith.divf %6, %19 : vector<8x4xf32>
    %cst_11 = arith.constant dense<0xFF800000> : vector<8xf32>
    %21 = vector.multi_reduction <maximumf>, %20, %cst_11 [1] : vector<8x4xf32> to vector<8xf32>
    %22 = vector.shape_cast %21 : vector<8xf32> to vector<8x1xf32>
    %23 = vector.broadcast %22 : vector<8x1xf32> to vector<8x4xf32>
    %24 = arith.subf %20, %23 : vector<8x4xf32>
    %25 = math.exp %24 : vector<8x4xf32>
    %cst_12 = arith.constant dense<0.000000e+00> : vector<8xf32>
    %26 = vector.multi_reduction <add>, %25, %cst_12 [1] : vector<8x4xf32> to vector<8xf32>
    %27 = vector.shape_cast %26 : vector<8xf32> to vector<8x1xf32>
    %28 = vector.broadcast %27 : vector<8x1xf32> to vector<8x4xf32>
    %29 = arith.divf %25, %28 : vector<8x4xf32>
    %30 = vector.shape_cast %29 : vector<8x4xf32> to vector<8x4x1xf32>
    %31 = vector.broadcast %30 : vector<8x4x1xf32> to vector<8x4x32xf32>
    %32 = arith.mulf %31, %2 : vector<8x4x32xf32>
    %cst_13 = arith.constant dense<0.000000e+00> : vector<8x32xf32>
    %33 = vector.multi_reduction <add>, %32, %cst_13 [1] : vector<8x4x32xf32> to vector<8x32xf32>
    %c0_14 = arith.constant 0 : index
    %c0_15 = arith.constant 0 : index
    %34 = vector.load %arg4[%c0_14, %c0_15] : memref<32x32xf32, #tpu.memory_space<vmem>>, vector<32x32xf32>
    %cst_16 = arith.constant dense<0.000000e+00> : vector<8x32xf32>
    %35 = tpu.matmul %33, %34, %cst_16 {dimension_numbers = #tpu.dot_dimension_numbers<[1], [1], [0], [0], [0, 0, 1, 0], [], []>} : vector<8x32xf32>, vector<32x32xf32>, vector<8x32xf32> -> vector<8x32xf32>
    %c0_17 = arith.constant 0 : index
    %c0_18 = arith.constant 0 : index
    %36 = vector.load %arg5[%c0_17, %c0_18] : memref<8x32xf32, #tpu.memory_space<vmem>>, vector<8x32xf32>
    tpu.vector_store %arg5[%c0_17, %c0_18], %35 {strides = array<i32>} : memref<8x32xf32, #tpu.memory_space<vmem>>, vector<8x32xf32>,
    return
  }
  func.func @transform_0(%arg0: i32) -> (i32, i32) {
    %c0_i32 = arith.constant 0 : i32
    %c0_i32_0 = arith.constant 0 : i32
    return %arg0, %c0_i32 : i32, i32
  }
  func.func @transform_1(%arg0: i32) -> (i32, i32, i32) {
    %c0_i32 = arith.constant 0 : i32
    %c0_i32_0 = arith.constant 0 : i32
    %c0_i32_1 = arith.constant 0 : i32
    return %arg0, %c0_i32, %c0_i32_0 : i32, i32, i32
  }
  func.func @transform_2(%arg0: i32) -> (i32, i32, i32) {
    %c0_i32 = arith.constant 0 : i32
    %c0_i32_0 = arith.constant 0 : i32
    %c0_i32_1 = arith.constant 0 : i32
    return %arg0, %c0_i32, %c0_i32_0 : i32, i32, i32
  }
  func.func @transform_3(%arg0: i32) -> (i32, i32) {
    %c0_i32 = arith.constant 0 : i32
    %c0_i32_0 = arith.constant 0 : i32
    %c0_i32_1 = arith.constant 0 : i32
    return %c0_i32, %c0_i32_0 : i32, i32
  }
  func.func @transform_4(%arg0: i32) -> (i32, i32) {
    %c0_i32 = arith.constant 0 : i32
    %c0_i32_0 = arith.constant 0 : i32
    return %arg0, %c0_i32 : i32, i32
  }
}

</mosaic_0001>

<bundles_post_ra>
// kernel: kv_memory_net_forward.1
= control target key start
LH: loop header
LB: loop body
LE: loop exit
PB: predicated region body
PF: predicated region fallthrough
CT: control target
= control target key end

     0   :  { %s1333_s15 = smov 0   ;;  %s1795_s0 = inlined_call_operand.vmem [shape: f32[16,32], index: 0, kind: input, shape index: {}]   ;;  %s1796_s1 = inlined_call_operand.vmem [shape: f32[16,4,32], index: 1, kind: input, shape index: {}]   ;;  %s1797_s2 = inlined_call_operand.vmem [shape: f32[16,4,32], index: 2, kind: input, shape index: {}]   ;;  %s1798_s3 = inlined_call_operand.vmem [shape: f32[32,32], index: 3, kind: input, shape index: {}]   ;;  %s1799_s4 = inlined_call_operand.vmem [shape: f32[16,32], index: 4, kind: output, shape index: {}]  }
   0x1 LB: > { %s1200_s16 = sadd.s32 4294967295, %s1305_s15   ;;  %p1204_p0 = scmp.ge.s32.totalorder %s1305_s15, 1  ;;  %s1305_s15 = sphi %s1333_s15, %s14_s15  }
   0x2   : > { %p183_p1 = scmp.lt.s32.totalorder %s1305_s15, 3 }
   0x4   : > { %p184_p2 = pnand %p1204_p0, %p183_p1 }
   0x5   : > { %s1206_s17 = sshll.u32 (!%p184_p2), %s1200_s16, 3  ;;  %p217_p3 = scmp.lt.s32.totalorder (!%p184_p2), %s1200_s16, 1 }
   0x6   : > { %187 = sbr.rel (%p184_p2) target bundleno = 1161 (0x489), region = 36  ;;  %p222_p4 = scmp.lt.s32.totalorder (!%p184_p2), %s1206_s17, 15 }
   0xb   : > { %s1825_s17 = smov (!%p222_p4, %s1206_s17), 15  ;;  %s1827_s16 = smov (!%p217_p3, %s1200_s16), 1  ;;  %vm1801_vm0 = vcmask 257024   ;;  %vm1800_vm1 = vcmask 261120   ;;  %v473_v57 = vlaneseq  ;;  %vm483_vm12 = vcmask 1041409  }
   0xc   : > { %s1207_s18 = sshll.u32 %s1825_s17, 2  ;;  %s1205_s22 = sshll.u32 %s1827_s16, 3  ;;  %vm485_vm14 = vcmask 1042434   ;;  %vm487_vm15 = vcmask 1043459  }
   0xd   : > { %s225_s21 = scalar_lea.vmem %s1796_s1, %s1207_s18  ;;  %s220_s25 = scalar_lea.vmem %s1795_s0, %s1205_s22 }
   0xe   : > { %v242_v0 = vld [vmem:[%s225_s21 + $0x10] sm:$0xf]  ;;  %v1351_v1 = vld [vmem:[%s225_s21 + $0x8] sm:$0xf]  ;;  %v238_v2 = vld [vmem:[%s225_s21] sm:$0xf]  ;;  %s1744_s28 = scalar_lea.vmem %s1797_s2, %s1207_s18  ;;  %s236_s13 = scalar_lea.vmem %s1799_s4, %s1205_s22 }
   0xf   : > { %v332_v3 = vmul.f32 %v242_v0, %v242_v0  ;;  %v330_v4 = vmul.f32 %v1351_v1, %v1351_v1  ;;  %v328_v5 = vmul.f32 %v238_v2, %v238_v2  ;;  %v1355_v6 = vld [vmem:[%s225_s21 + $0x14] sm:$0xf]  ;;  %v241_v7 = vld [vmem:[%s225_s21 + $0xc] sm:$0xf]  ;;  %v239_v11 = vld [vmem:[%s225_s21 + $0x4] sm:$0xf] }
  0x10   : > { %v333_v12 = vmul.f32 %v1355_v6, %v1355_v6  ;;  %v331_v13 = vmul.f32 %v241_v7, %v241_v7  ;;  %v329_v14 = vmul.f32 %v239_v11, %v239_v11  ;;  %v1371_v18 = vld [vmem:[%s225_s21 + $0x1c] sm:$0xf]  ;;  %v1373_v19 = vld [vmem:[%s220_s25] sm:$0xff]  ;;  %v1375_v20 = vld [vmem:[%s225_s21 + $0x18] sm:$0xf] }
  0x11   : > { %v348_v8 = vsel %vm1801_vm0, %v332_v3, 0.0  ;;  %v342_v9 = vsel %vm1801_vm0, %v330_v4, 0.0  ;;  %v336_v10 = vsel %vm1801_vm0, %v328_v5, 0.0  ;;  %v335_v21 = vmul.f32 %v1371_v18, %v1371_v18 }
  0x12   : > { %349 = vadd.xlane.f32.xlu2 %v348_v8  ;;  %343 = vadd.xlane.f32.xlu1 %v342_v9  ;;  %v351_v15 = vsel %vm1801_vm0, %v333_v12, 0.0  ;;  %v345_v16 = vsel %vm1801_vm0, %v331_v13, 0.0  ;;  %v339_v17 = vsel %vm1801_vm0, %v329_v14, 0.0  ;;  %v311_v22 = vmul.f32 %v1373_v19, %v1373_v19 }
  0x13   : > { %337 = vadd.xlane.f32.xlu0 %v336_v10  ;;  %v334_v23 = vmul.f32 %v1375_v20, %v1375_v20  ;;  %v357_v24 = vsel %vm1801_vm0, %v335_v21, 0.0  ;;  %v262_v27 = vperm.slane %v1373_v19, 0  ;;  %v257_v30 = vrot.slane %v1373_v19, 3 }
  0x14   : > { %v313_v25 = vsel %vm1800_vm1, %v311_v22, 0.0  ;;  %v255_v31 = vrot.slane %v1373_v19, 1  ;;  %v258_v38 = vrot.slane %v1373_v19, 4  ;;  %v256_v44 = vrot.slane %v1373_v19, 2 }
  0x15   : > { %v354_v26 = vsel %vm1801_vm0, %v334_v23, 0.0  ;;  %v278_v28 = vmul.f32 %v262_v27, %v238_v2  ;;  %v265_v32 = vperm.slane %v257_v30, 0  ;;  %v1418_v3 = vand.u32 127, %v473_v57 }
  0x16   : > { %v263_v33 = vperm.slane %v255_v31, 0  ;;  %v266_v39 = vperm.slane %v258_v38, 0  ;;  %v264_v47 = vperm.slane %v256_v44, 0 }
  0x17   : > { %v287_v29 = vsel %vm1801_vm0, %v278_v28, 0.0  ;;  %v281_v34 = vmul.f32 %v265_v32, %v241_v7 }
  0x18   : > { %v279_v35 = vmul.f32 %v263_v33, %v239_v11  ;;  %v282_v42 = vmul.f32 %v266_v39, %v242_v0  ;;  %v280_v59 = vmul.f32 %v264_v47, %v1351_v1 }
  0x19   : > { %v296_v36 = vsel %vm1801_vm0, %v281_v34, 0.0 }
  0x1a   : > { %352 = vadd.xlane.f32.xlu2 %v351_v15  ;;  %346 = vadd.xlane.f32.xlu1 %v345_v16  ;;  %v290_v37 = vsel %vm1801_vm0, %v279_v35, 0.0  ;;  %v299_v45 = vsel %vm1801_vm0, %v282_v42, 0.0  ;;  %v293_v5 = vsel %vm1801_vm0, %v280_v59, 0.0 }
  0x1b   : > { %340 = vadd.xlane.f32.xlu0 %v339_v17 }
  0x22   : > { %358 = vadd.xlane.f32.xlu1 %v357_v24  ;;  %314 = vadd.xlane.f32.xlu2 %v313_v25 }
  0x23   : > { %355 = vadd.xlane.f32.xlu0 %v354_v26 }
  0x2a   : > { %288 = vadd.xlane.f32.xlu2 %v287_v29  ;;  %291 = vadd.xlane.f32.xlu1 %v290_v37 }
  0x2b   : > { %294 = vadd.xlane.f32.xlu0 %v293_v5 }
  0x32   : > { %297 = vadd.xlane.f32.xlu2 %v296_v36  ;;  %300 = vadd.xlane.f32.xlu1 %v299_v45 }
  0x85   : > { %v1393_v40 = vpop.xlane.xlu2 %349  ;;  %v1395_v41 = vpop.xlane.xlu1 %343 }
  0x86   : > { %1233 = vrsqrt.f32 %v1393_v40  ;;  %v1398_v43 = vpop.xlane.xlu0 %337  ;;  %vm415_vm2 = vcmp.eq.f32.partialorder %v1393_v40, inf  ;;  %vm417_vm3 = vcmp.eq.f32.partialorder %v1393_v40, 0.0  ;;  %v418_v15 = vand.u32 2147483648, %v1393_v40 }
  0x87   : > { %1235 = vrsqrt.f32 %v1395_v41  ;;  %vm391_vm4 = vcmp.eq.f32.partialorder %v1395_v41, inf  ;;  %vm393_vm5 = vcmp.eq.f32.partialorder %v1395_v41, 0.0  ;;  %v394_v22 = vand.u32 2147483648, %v1395_v41 }
  0x88   : > { %1237 = vrsqrt.f32 %v1398_v43  ;;  %vm367_vm6 = vcmp.eq.f32.partialorder %v1398_v43, inf  ;;  %vm369_vm7 = vcmp.eq.f32.partialorder %v1398_v43, 0.0  ;;  %v370_v30 = vand.u32 2147483648, %v1398_v43 }
  0x8c   : > { %v1234_v46 = vpop.eup %1233 }
  0x8d   : > { %v1236_v48 = vpop.eup %1235  ;;  %v409_v49 = vmul.f32 %v1234_v46, %v1393_v40  ;;  %v1405_v50 = vpop.xlane.xlu2 %352 }
  0x8e   : > { %v1407_v51 = vpop.xlane.xlu1 %346  ;;  %v1238_v52 = vpop.eup %1237  ;;  %v385_v53 = vmul.f32 %v1236_v48, %v1395_v41  ;;  %1239 = vrsqrt.f32 %v1405_v50  ;;  %vm427_vm8 = vcmp.eq.f32.partialorder %v1405_v50, inf  ;;  %v430_v32 = vand.u32 2147483648, %v1405_v50 }
  0x8f   : > { %v1411_v54 = vpop.xlane.xlu0 %340  ;;  %v410_v55 = vmul.f32 %v1234_v46, %v409_v49  ;;  %v361_v56 = vmul.f32 %v1238_v52, %v1398_v43  ;;  %1241 = vrsqrt.f32 %v1407_v51  ;;  %vm403_vm9 = vcmp.eq.f32.partialorder %v1407_v51, inf }
  0x90   : > { %v386_v58 = vmul.f32 %v1236_v48, %v385_v53  ;;  %1243 = vrsqrt.f32 %v1411_v54  ;;  %vm405_vm10 = vcmp.eq.f32.partialorder %v1407_v51, 0.0  ;;  %v406_v45 = vand.u32 2147483648, %v1407_v51 }
  0x91   : > { %v411_v60 = vmul.f32 0.5, %v410_v55  ;;  %v362_v61 = vmul.f32 %v1238_v52, %v361_v56  ;;  %vm429_vm11 = vcmp.eq.f32.partialorder %v1405_v50, 0.0  ;;  %vm379_vm13 = vcmp.eq.f32.partialorder %v1411_v54, inf }
  0x92   : > { %v387_v62 = vmul.f32 0.5, %v386_v58 }
  0x93   : > { %v412_v63 = vsub.f32 1.5, %v411_v60  ;;  %v363_v0 = vmul.f32 0.5, %v362_v61 }
  0x94   : > { %v1240_v2 = vpop.eup %1239  ;;  %v388_v4 = vsub.f32 1.5, %v387_v62  ;;  %v382_v62 = vand.u32 2147483648, %v1411_v54 }
  0x95   : > { %v1242_v7 = vpop.eup %1241  ;;  %v413_v8 = vmul.f32 %v1234_v46, %v412_v63  ;;  %v364_v9 = vsub.f32 1.5, %v363_v0  ;;  %v421_v1 = vmul.f32 %v1240_v2, %v1405_v50  ;;  %v1455_v47 = vpop.xlane.xlu2 %314 }
  0x96   : > { %v1423_v10 = vpop.xlane.xlu1 %358  ;;  %v389_v11 = vmul.f32 %v1236_v48, %v388_v4  ;;  %v397_v12 = vmul.f32 %v1242_v7, %v1407_v51  ;;  %v1244_v14 = vpop.eup %1243 }
  0x97   : > { %1245 = vrsqrt.f32 %v1423_v10  ;;  %v1428_v13 = vpop.xlane.xlu0 %355  ;;  %v365_v16 = vmul.f32 %v1238_v52, %v364_v9  ;;  %v422_v17 = vmul.f32 %v1240_v2, %v421_v1  ;;  %v414_v21 = vmul.f32 %v413_v8, %v1393_v40 }
  0x98   : > { %v398_v23 = vmul.f32 %v1242_v7, %v397_v12  ;;  %v373_v24 = vmul.f32 %v1244_v14, %v1411_v54  ;;  %1247 = vrsqrt.f32 %v1428_v13  ;;  %v390_v27 = vmul.f32 %v389_v11, %v1395_v41 }
  0x99   : > { %v366_v25 = vmul.f32 %v365_v16, %v1398_v43  ;;  %v423_v26 = vmul.f32 0.5, %v422_v17  ;;  %v416_v34 = vsel %vm415_vm2, %v1393_v40, %v414_v21  ;;  %vm381_vm2 = vcmp.eq.f32.partialorder %v1411_v54, 0.0 }
  0x9a   : > { %v399_v28 = vmul.f32 0.5, %v398_v23  ;;  %v374_v29 = vmul.f32 %v1244_v14, %v373_v24  ;;  %v392_v42 = vsel %vm391_vm4, %v1395_v41, %v390_v27  ;;  %v419_v49 = vsel %vm417_vm3, %v418_v15, %v416_v34 }
  0x9b   : > { %v424_v31 = vsub.f32 1.5, %v423_v26  ;;  %v368_v35 = vsel %vm367_vm6, %v1398_v43, %v366_v25  ;;  %v395_v40 = vsel %vm393_vm5, %v394_v22, %v392_v42  ;;  %1249 = vrsqrt.f32 %v1455_v47 }
  0x9c   : > { %v400_v36 = vsub.f32 1.5, %v399_v28  ;;  %v375_v37 = vmul.f32 0.5, %v374_v29  ;;  %v371_v52 = vsel %vm369_vm7, %v370_v30, %v368_v35  ;;  %v461_v0 = vmax.f32 %v419_v49, 1e-08 }
  0x9d   : > { %v1246_v33 = vpop.eup %1245  ;;  %v425_v38 = vmul.f32 %v1240_v2, %v424_v31  ;;  %v457_v2 = vmax.f32 %v371_v52, 1e-08  ;;  %v459_v5 = vmax.f32 %v395_v40, 1e-08  ;;  %vm451_vm3 = vcmp.eq.f32.partialorder %v1423_v10, inf }
  0x9e   : > { %v445_v39 = vmul.f32 %v1246_v33, %v1423_v10  ;;  %v401_v44 = vmul.f32 %v1242_v7, %v400_v36  ;;  %v376_v46 = vsub.f32 1.5, %v375_v37  ;;  %v1248_v48 = vpop.eup %1247  ;;  %vm489_vm4 = vcmask 1044484  }
  0x9f   : > { %v426_v55 = vmul.f32 %v425_v38, %v1405_v50  ;;  %v433_v59 = vmul.f32 %v1248_v48, %v1428_v13  ;;  %v475_v17 = vperm.slane %v457_v2, %v1418_v3  ;;  %vm453_vm5 = vcmp.eq.f32.partialorder %v1423_v10, 0.0 }
  0xa0   : > { %v446_v53 = vmul.f32 %v1246_v33, %v445_v39  ;;  %v402_v56 = vmul.f32 %v401_v44, %v1407_v51  ;;  %v377_v58 = vmul.f32 %v1244_v14, %v376_v46  ;;  %v502_v14 = vshrl.u32 %v473_v57, 7 }
  0xa1   : > { %v434_v63 = vmul.f32 %v1248_v48, %v433_v59  ;;  %v428_v7 = vsel %vm427_vm8, %v1405_v50, %v426_v55  ;;  %v1250_v16 = vpop.eup %1249  ;;  %v454_v22 = vand.u32 2147483648, %v1423_v10  ;;  %v479_v25 = vperm.slane %v461_v0, %v1418_v3 }
  0xa2   : > { %v447_v43 = vmul.f32 0.5, %v446_v53  ;;  %v404_v60 = vsel %vm403_vm9, %v1407_v51, %v402_v56  ;;  %v378_v61 = vmul.f32 %v377_v58, %v1411_v54  ;;  %1229 = vset.pattern.permute.xlu2 %v502_v14  ;;  %1228 = vset.pattern.permute.xlu1 %v502_v14  ;;  %v317_v24 = vmul.f32 %v1250_v16, %v1455_v47 }
  0xa3   : > { %v407_v41 = vsel %vm405_vm10, %v406_v45, %v404_v60  ;;  %v435_v9 = vmul.f32 0.5, %v434_v63  ;;  %1227 = vset.pattern.permute.xlu0 %v502_v14  ;;  %v477_v26 = vperm.slane %v459_v5, %v1418_v3  ;;  %vm439_vm6 = vcmp.eq.f32.partialorder %v1428_v13, inf }
  0xa4   : > { %v448_v4 = vsub.f32 1.5, %v447_v43  ;;  %v380_v8 = vsel %vm379_vm13, %v1411_v54, %v378_v61  ;;  %v460_v1 = vmax.f32 %v407_v41, 1e-08  ;;  %v431_v54 = vsel %vm429_vm11, %v430_v32, %v428_v7 }
  0xa5   : > { %v383_v11 = vsel %vm381_vm2, %v382_v62, %v380_v8  ;;  %v436_v15 = vsub.f32 1.5, %v435_v9  ;;  %v318_v31 = vmul.f32 %v1250_v16, %v317_v24  ;;  %v462_v32 = vmax.f32 %v431_v54, 1e-08 }
  0xa6   : > { %v449_v12 = vmul.f32 %v1246_v33, %v448_v4  ;;  %v458_v51 = vmax.f32 %v383_v11, 1e-08  ;;  %v478_v27 = vperm.slane %v460_v1, %v1418_v3  ;;  %v442_v34 = vand.u32 2147483648, %v1428_v13 }
  0xa7   : > { %v437_v23 = vmul.f32 %v1248_v48, %v436_v15  ;;  %vm441_vm7 = vcmp.eq.f32.partialorder %v1428_v13, 0.0  ;;  %vm491_vm8 = vcmask 1045509   ;;  %v480_v45 = vperm.slane %v462_v32, %v1418_v3 }
  0xa8   : > { %v450_v21 = vmul.f32 %v449_v12, %v1423_v10  ;;  %v476_v57 = vperm.slane %v458_v51, %v1418_v3  ;;  %vm493_vm9 = vcmask 1046534   ;;  %vm1802_vm10 = vcmask 1047559  }
  0xa9   : > { %v438_v30 = vmul.f32 %v437_v23, %v1428_v13  ;;  %vm323_vm11 = vcmp.eq.f32.partialorder %v1455_v47, inf  ;;  %v326_v55 = vand.u32 2147483648, %v1455_v47  ;;  %vm325_vm13 = vcmp.eq.f32.partialorder %v1455_v47, 0.0 }
  0xaa   : > { %v452_v28 = vsel %vm451_vm3, %v1423_v10, %v450_v21  ;;  %v484_v29 = vsel %vm483_vm12, %v476_v57, %v475_v17  ;;  %v319_v10 = vmul.f32 0.5, %v318_v31  ;;  %v259_v7 = vrot.slane %v1373_v19, 5  ;;  %v1530_v17 = vpop.xlane.xlu2 %288 }
  0xab   : > { %v455_v50 = vsel %vm453_vm5, %v454_v22, %v452_v28  ;;  %v486_v33 = vsel %vm485_vm14, %v477_v26, %v484_v29  ;;  %v440_v36 = vsel %vm439_vm6, %v1428_v13, %v438_v30  ;;  %v261_v9 = vrot.slane %v1373_v19, 7  ;;  %v1534_v22 = vpop.xlane.xlu1 %291 }
  0xac   : > { %v488_v35 = vsel %vm487_vm15, %v478_v27, %v486_v33  ;;  %v464_v37 = vmax.f32 %v455_v50, 1e-08  ;;  %v443_v38 = vsel %vm441_vm7, %v442_v34, %v440_v36  ;;  %v320_v44 = vsub.f32 1.5, %v319_v10  ;;  %v295_v50 = vpop.xlane.xlu0 %294 }
  0xad   : > { %v463_v39 = vmax.f32 %v443_v38, 1e-08  ;;  %v490_v42 = vsel %vm489_vm4, %v479_v25, %v488_v35  ;;  %v267_v1 = vperm.slane %v259_v7, 0  ;;  %v269_v12 = vperm.slane %v261_v9, 0 }
  0xae   : > { %v321_v48 = vmul.f32 %v1250_v16, %v320_v44  ;;  %v482_v49 = vperm.slane %v464_v37, %v1418_v3  ;;  %v492_v52 = vsel %vm491_vm8, %v480_v45, %v490_v42 }
  0xaf   : > { %v481_v46 = vperm.slane %v463_v39, %v1418_v3  ;;  %v283_v14 = vmul.f32 %v267_v1, %v1355_v6  ;;  %v285_v51 = vmul.f32 %v269_v12, %v1371_v18 }
  0xb0   : > { %v322_v53 = vmul.f32 %v321_v48, %v1455_v47 }
  0xb1   : > { %v494_v13 = vsel %vm493_vm9, %v481_v46, %v492_v52  ;;  %v302_v15 = vsel %vm1801_vm0, %v283_v14, 0.0  ;;  %v308_v16 = vsel %vm1801_vm0, %v285_v51, 0.0 }
  0xb2   : > { %v324_v56 = vsel %vm323_vm11, %v1455_v47, %v322_v53  ;;  %v496_v58 = vsel %vm1802_vm10, %v482_v49, %v494_v13  ;;  %v260_v47 = vrot.slane %v1373_v19, 6  ;;  %v1307_v19 = vmov 0  }
  0xb3   : > { %v327_v59 = vsel %vm325_vm13, %v326_v55, %v324_v56  ;;  %v1538_v28 = vpop.xlane.xlu1 %300 }
  0xb4   : > { %v456_v40 = vmax.f32 %v327_v59, 1e-08  ;;  %v268_v5 = vperm.slane %v260_v47, 0 }
  0xb6   : > { %v498_v43 = vmul.f32 %v496_v58, %v456_v40  ;;  %v284_v8 = vmul.f32 %v268_v5, %v1375_v20  ;;  %v1532_v20 = vpop.xlane.xlu2 %297 }
  0xb8   : > { %v514_v60 = vperm.slane %v498_v43, 2  ;;  %v500_v61 = vperm.slane %v498_v43, 0  ;;  %v507_v62 = vperm.slane %v498_v43, 1  ;;  %v521_v63 = vperm.slane %v498_v43, 3 }
  0xb9   : > { %v549_v0 = vperm.slane %v498_v43, 7  ;;  %v528_v2 = vperm.slane %v498_v43, 4  ;;  %v535_v41 = vperm.slane %v498_v43, 5  ;;  %v542_v4 = vperm.slane %v498_v43, 6 }
  0xba   : > { %519 = vperm.xlu2 %1229, %v514_v60   ;;  %505 = vperm.xlu0 %1227, %v500_v61   ;;  %v305_v11 = vsel %vm1801_vm0, %v284_v8, 0.0 }
  0xbb   : > { %512 = vperm.xlu1 %1228, %v507_v62  }
  0xc2   : > { %526 = vperm.xlu2 %1229, %v521_v63   ;;  %554 = vperm.xlu0 %1227, %v549_v0  }
  0xc3   : > { %533 = vperm.xlu1 %1228, %v528_v2  }
  0xca   : > { %540 = vperm.xlu2 %1229, %v535_v41   ;;  %1231 = vset.pattern.permute.xlu0 %v1307_v19 }
  0xcb   : > { %547 = vperm.xlu1 %1228, %v542_v4  }
  0xd2   : > { %1230 = vset.pattern.permute.xlu2 %v1307_v19 }
  0xd3   : > { %1232 = vset.pattern.permute.xlu1 %v1307_v19 }
  0xec   : > { %306 = vadd.xlane.f32.xlu0 %v305_v11 }
  0xf3   : > { %303 = vadd.xlane.f32.xlu2 %v302_v15 }
  0xf5   : > { %309 = vadd.xlane.f32.xlu1 %v308_v16 }
 0x114   : > { %v520_v21 = vpop.permute.xlu2 %519 }
 0x115   : > { %1251 = vrcp.f32 %v520_v21  ;;  %v605_v57 = vand.u32 2147483648, %v520_v21  ;;  %v603_v24 = vand.u32 2147483647, %v520_v21  ;;  %vm599_vm3 = vweird.f32 %v520_v21 }
 0x117   : > { %v606_v26 = vor.u32 1.1754944e-38, %v605_v57  ;;  %vm604_vm6 = vcmp.eq.f32.partialorder %v603_v24, 8.507059e+37 }
 0x11b   : > { %v1252_v6 = vpop.eup %1251 }
 0x11c   : > { %v595_v18 = vmul.f32 %v1252_v6, %v520_v21  ;;  %vm600_vm2 = vweird.f32 %v1252_v6  ;;  %v1536_v27 = vpop.permute.xlu2 %526 }
 0x11d   : > { %vm601_vm5 = vmor %vm599_vm3, %vm600_vm2  ;;  %1253 = vrcp.f32 %v1536_v27  ;;  %v620_v56 = vand.u32 2147483648, %v1536_v27  ;;  %vm614_vm10 = vweird.f32 %v1536_v27  ;;  %v618_v47 = vand.u32 2147483647, %v1536_v27 }
 0x11e   : > { %v596_v54 = vsub.f32 1.0, %v595_v18 }
 0x11f   : > { %v621_v11 = vor.u32 1.1754944e-38, %v620_v56 }
 0x120   : > { %v597_v23 = vmul.f32 %v1252_v6, %v596_v54 }
 0x122   : > { %v598_v25 = vadd.f32 %v1252_v6, %v597_v23 }
 0x123   : > { %v1544_v32 = vpop.eup %1253 }
 0x124   : > { %v602_v29 = vsel %vm601_vm5, %v1252_v6, %v598_v25  ;;  %v610_v35 = vmul.f32 %v1544_v32, %v1536_v27  ;;  %vm615_vm5 = vweird.f32 %v1544_v32 }
 0x125   : > { %v607_v30 = vsel %vm604_vm6, %v606_v26, %v602_v29 }
 0x126   : > { %v1540_v31 = vmul.f32 %v607_v30, %v295_v50  ;;  %v611_v10 = vsub.f32 1.0, %v610_v35 }
 0x128   : > { %699 = vperm.xlu1 %1232, %v1540_v31   ;;  %v612_v45 = vmul.f32 %v1544_v32, %v611_v10 }
 0x12a   : > { %v613_v62 = vadd.f32 %v1544_v32, %v612_v45 }
 0x12c   : > { %v506_v33 = vpop.permute.xlu0 %505 }
 0x12d   : > { %1255 = vrcp.f32 %v506_v33  ;;  %v513_v34 = vpop.permute.xlu1 %512  ;;  %v575_v46 = vand.u32 2147483648, %v506_v33  ;;  %v573_v13 = vand.u32 2147483647, %v506_v33  ;;  %vm569_vm13 = vweird.f32 %v506_v33 }
 0x12e   : > { %1257 = vrcp.f32 %v513_v34  ;;  %v590_v52 = vand.u32 2147483648, %v513_v34  ;;  %v588_v55 = vand.u32 2147483647, %v513_v34  ;;  %vm584_vm2 = vweird.f32 %v513_v34 }
 0x12f   : > { %v576_v59 = vor.u32 1.1754944e-38, %v575_v46  ;;  %vm574_vm6 = vcmp.eq.f32.partialorder %v573_v13, 8.507059e+37 }
 0x130   : > { %v591_v60 = vor.u32 1.1754944e-38, %v590_v52  ;;  %vm589_vm0 = vcmp.eq.f32.partialorder %v588_v55, 8.507059e+37 }
 0x133   : > { %v1256_v36 = vpop.eup %1255 }
 0x134   : > { %v1258_v37 = vpop.eup %1257  ;;  %v565_v38 = vmul.f32 %v1256_v36, %v506_v33  ;;  %vm570_vm7 = vweird.f32 %v1256_v36  ;;  %v555_v57 = vpop.permute.xlu0 %554 }
 0x135   : > { %v580_v39 = vmul.f32 %v1258_v37, %v513_v34  ;;  %v534_v42 = vpop.permute.xlu1 %533  ;;  %vm585_vm11 = vweird.f32 %v1258_v37  ;;  %vm571_vm3 = vmor %vm569_vm13, %vm570_vm7  ;;  %v678_v55 = vand.u32 2147483647, %v555_v57 }
 0x136   : > { %v566_v44 = vsub.f32 1.0, %v565_v38  ;;  %1259 = vrcp.f32 %v534_v42  ;;  %vm586_vm1 = vmor %vm584_vm2, %vm585_vm11  ;;  %v635_v8 = vand.u32 2147483648, %v534_v42  ;;  %v633_v14 = vand.u32 2147483647, %v534_v42 }
 0x137   : > { %v581_v48 = vsub.f32 1.0, %v580_v39  ;;  %vm616_vm7 = vmor %vm614_vm10, %vm615_vm5  ;;  %vm629_vm11 = vweird.f32 %v534_v42 }
 0x138   : > { %v567_v49 = vmul.f32 %v1256_v36, %v566_v44  ;;  %v617_v1 = vsel %vm616_vm7, %v1544_v32, %v613_v62  ;;  %v636_v16 = vor.u32 1.1754944e-38, %v635_v8  ;;  %vm634_vm10 = vcmp.eq.f32.partialorder %v633_v14, 8.507059e+37 }
 0x139   : > { %v582_v53 = vmul.f32 %v1258_v37, %v581_v48 }
 0x13a   : > { %v568_v58 = vadd.f32 %v1256_v36, %v567_v49 }
 0x13b   : > { %v583_v40 = vadd.f32 %v1258_v37, %v582_v53  ;;  %v680_v53 = vand.u32 2147483648, %v555_v57 }
 0x13c   : > { %v1260_v43 = vpop.eup %1259  ;;  %v572_v61 = vsel %vm571_vm3, %v1256_v36, %v568_v58 }
 0x13d   : > { %v625_v63 = vmul.f32 %v1260_v43, %v534_v42  ;;  %v577_v0 = vsel %vm574_vm6, %v576_v59, %v572_v61  ;;  %v587_v2 = vsel %vm586_vm1, %v1258_v37, %v583_v40  ;;  %v548_v9 = vpop.permute.xlu1 %547  ;;  %vm619_vm1 = vcmp.eq.f32.partialorder %v618_v47, 8.507059e+37 }
 0x13e   : > { %v1554_v41 = vmul.f32 %v577_v0, %v1530_v17  ;;  %v592_v4 = vsel %vm589_vm0, %v591_v60, %v587_v2  ;;  %vm630_vm0 = vweird.f32 %v1260_v43  ;;  %1261 = vrcp.f32 %v548_v9 }
 0x13f   : > { %v626_v5 = vsub.f32 1.0, %v625_v63  ;;  %v1558_v7 = vmul.f32 %v592_v4, %v1534_v22  ;;  %v622_v51 = vsel %vm619_vm1, %v621_v11, %v617_v1  ;;  %vm631_vm13 = vmor %vm629_vm11, %vm630_vm0  ;;  %v541_v22 = vpop.permute.xlu2 %540  ;;  %v665_v50 = vand.u32 2147483648, %v548_v9 }
 0x140   : > { %693 = vperm.xlu2 %1230, %v1554_v41   ;;  %v1566_v19 = vmul.f32 %v622_v51, %v1532_v20  ;;  %1263 = vrcp.f32 %v541_v22  ;;  %vm659_vm3 = vweird.f32 %v548_v9  ;;  %v650_v39 = vand.u32 2147483648, %v541_v22 }
 0x141   : > { %v627_v12 = vmul.f32 %v1260_v43, %v626_v5  ;;  %696 = vperm.xlu0 %1231, %v1558_v7   ;;  %1265 = vrcp.f32 %v555_v57  ;;  %v666_v34 = vor.u32 1.1754944e-38, %v665_v50  ;;  %vm644_vm0 = vweird.f32 %v541_v22 }
 0x142   : > { %v648_v42 = vand.u32 2147483647, %v541_v22  ;;  %v651_v46 = vor.u32 1.1754944e-38, %v650_v39  ;;  %v681_v58 = vor.u32 1.1754944e-38, %v680_v53 }
 0x143   : > { %v628_v15 = vadd.f32 %v1260_v43, %v627_v12 }
 0x144   : > { %v1262_v18 = vpop.eup %1261  ;;  %vm649_vm11 = vcmp.eq.f32.partialorder %v648_v42, 8.507059e+37 }
 0x145   : > { %v632_v17 = vsel %vm631_vm13, %v1260_v43, %v628_v15  ;;  %v655_v54 = vmul.f32 %v1262_v18, %v548_v9  ;;  %vm660_vm2 = vweird.f32 %v1262_v18 }
 0x146   : > { %v637_v21 = vsel %vm634_vm10, %v636_v16, %v632_v17  ;;  %v1264_v23 = vpop.eup %1263  ;;  %vm661_vm5 = vmor %vm659_vm3, %vm660_vm2  ;;  %vm674_vm10 = vweird.f32 %v555_v57  ;;  %vm679_vm3 = vcmp.eq.f32.partialorder %v678_v55, 8.507059e+37 }
 0x147   : > { %v1569_v6 = vmul.f32 %v637_v21, %v1538_v28  ;;  %v656_v24 = vsub.f32 1.0, %v655_v54  ;;  %v640_v25 = vmul.f32 %v1264_v23, %v541_v22  ;;  %v1266_v27 = vpop.eup %1265  ;;  %v663_v28 = vand.u32 2147483647, %v548_v9 }
 0x148   : > { %702 = vperm.xlu2 %1230, %v1566_v19   ;;  %v670_v30 = vmul.f32 %v1266_v27, %v555_v57  ;;  %vm645_vm7 = vweird.f32 %v1264_v23  ;;  %vm675_vm13 = vweird.f32 %v1266_v27 }
 0x149   : > { %705 = vperm.xlu1 %1232, %v1569_v6   ;;  %v657_v26 = vmul.f32 %v1262_v18, %v656_v24  ;;  %v641_v20 = vsub.f32 1.0, %v640_v25  ;;  %vm664_vm6 = vcmp.eq.f32.partialorder %v663_v28, 8.507059e+37  ;;  %vm646_vm1 = vmor %vm644_vm0, %vm645_vm7 }
 0x14a   : > { %v671_v35 = vsub.f32 1.0, %v670_v30  ;;  %vm676_vm2 = vmor %vm674_vm10, %vm675_vm13 }
 0x14b   : > { %v658_v29 = vadd.f32 %v1262_v18, %v657_v26  ;;  %v642_v32 = vmul.f32 %v1264_v23, %v641_v20 }
 0x14c   : > { %v672_v45 = vmul.f32 %v1266_v27, %v671_v35 }
 0x14d   : > { %v662_v33 = vsel %vm661_vm5, %v1262_v18, %v658_v29  ;;  %v643_v37 = vadd.f32 %v1264_v23, %v642_v32  ;;  %vm732_vm5 = vcmask 31744  }
 0x14e   : > { %v667_v10 = vsel %vm664_vm6, %v666_v34, %v662_v33  ;;  %v673_v13 = vadd.f32 %v1266_v27, %v672_v45  ;;  %vm1803_vm6 = vcmask 1047559  }
 0x14f   : > { %v647_v44 = vsel %vm646_vm1, %v1264_v23, %v643_v37  ;;  %vm1804_vm7 = vmmov %vm1803_vm6 }
 0x150   : > { %v652_v48 = vsel %vm649_vm11, %v651_v46, %v647_v44  ;;  %v677_v56 = vsel %vm676_vm2, %v1266_v27, %v673_v13 }
 0x151   : > { %v682_v40 = vsel %vm679_vm3, %v681_v58, %v677_v56 }
 0x15f   : > { %v307_v36 = vpop.xlane.xlu0 %306 }
 0x160   : > { %v1573_v38 = vmul.f32 %v667_v10, %v307_v36 }
 0x162   : > { %711 = vperm.xlu1 %1232, %v1573_v38  }
 0x166   : > { %v304_v49 = vpop.xlane.xlu2 %303 }
 0x167   : > { %v1576_v52 = vmul.f32 %v652_v48, %v304_v49 }
 0x168   : > { %v310_v59 = vpop.xlane.xlu1 %309 }
 0x169   : > { %708 = vperm.xlu2 %1230, %v1576_v52   ;;  %v683_v43 = vmul.f32 %v682_v40, %v310_v59 }
 0x171   : > { %714 = vperm.xlu2 %1230, %v683_v43  }
 0x19a   : > { %v694_v60 = vpop.permute.xlu2 %693  ;;  %v700_v62 = vpop.permute.xlu1 %699 }
 0x19b   : > { %v716_v4 = vperm.slane %v694_v60, %v1418_v3  ;;  %v718_v8 = vperm.slane %v700_v62, %v1418_v3 }
 0x1a2   : > { %v703_v61 = vpop.permute.xlu2 %702 }
 0x1a3   : > { %v719_v11 = vperm.slane %v703_v61, %v1418_v3 }
 0x1b3   : > { %v697_v63 = vpop.permute.xlu0 %696 }
 0x1b4   : > { %v717_v2 = vperm.slane %v697_v63, %v1418_v3 }
 0x1b6   : > { %v724_v5 = vsel %vm483_vm12, %v717_v2, %v716_v4 }
 0x1b7   : > { %v725_v9 = vsel %vm485_vm14, %v718_v8, %v724_v5 }
 0x1b8   : > { %v726_v51 = vsel %vm487_vm15, %v719_v11, %v725_v9 }
 0x1bb   : > { %v706_v47 = vpop.permute.xlu1 %705 }
 0x1bc   : > { %v720_v1 = vperm.slane %v706_v47, %v1418_v3 }
 0x1be   : > { %v727_v16 = vsel %vm489_vm4, %v720_v1, %v726_v51 }
 0x1c3   : > { %v709_v0 = vpop.permute.xlu2 %708 }
 0x1c4   : > { %v721_v12 = vperm.slane %v709_v0, %v1418_v3 }
 0x1c6   : > { %v728_v21 = vsel %vm491_vm8, %v721_v12, %v727_v16 }
 0x1cb   : > { %v715_v14 = vpop.permute.xlu2 %714 }
 0x1cc   : > { %v723_v22 = vperm.slane %v715_v14, %v1418_v3 }
 0x1d4   : > { %v712_v15 = vpop.permute.xlu1 %711 }
 0x1d5   : > { %v722_v17 = vperm.slane %v712_v15, %v1418_v3 }
 0x1d7   : > { %v729_v18 = vsel %vm493_vm9, %v722_v17, %v728_v21 }
 0x1d8   : > { %v730_v54 = vsel %vm1803_vm6, %v723_v22, %v729_v18 }
 0x1d9   : > { %v733_v57 = vsel %vm732_vm5, %v730_v54, -inf }
 0x1da   : > { %734 = vmax.xlane.f32.xlu0 %v733_v57 }
 0x24d   : > { %v735_v23 = vpop.xlane.xlu0 %734 }
 0x24e   : > { %v738_v24 = vperm.slane %v735_v23, 1  ;;  %v737_v25 = vperm.slane %v735_v23, 0  ;;  %v740_v27 = vperm.slane %v735_v23, 3  ;;  %v739_v29 = vperm.slane %v735_v23, 2 }
 0x24f   : > { %v742_v34 = vperm.slane %v735_v23, 5  ;;  %v741_v36 = vperm.slane %v735_v23, 4  ;;  %v743_v42 = vperm.slane %v735_v23, 6 }
 0x250   : > { %v754_v26 = vsub.f32 %v1558_v7, %v738_v24  ;;  %v753_v20 = vsub.f32 %v1554_v41, %v737_v25  ;;  %v756_v30 = vsub.f32 %v1566_v19, %v740_v27  ;;  %v755_v32 = vsub.f32 %v1540_v31, %v739_v29 }
 0x251   : > { %v758_v41 = vsub.f32 %v1576_v52, %v742_v34  ;;  %v757_v7 = vsub.f32 %v1569_v6, %v741_v36  ;;  %v744_v31 = vperm.slane %v735_v23, 7  ;;  %v759_v48 = vsub.f32 %v1573_v38, %v743_v42 }
 0x252   : > { %v763_v50 = vmul.f32 1.442695, %v754_v26  ;;  %v761_v28 = vmul.f32 1.442695, %v753_v20  ;;  %v767_v33 = vmul.f32 1.442695, %v756_v30 }
 0x253   : > { %v765_v35 = vmul.f32 1.442695, %v755_v32  ;;  %v771_v19 = vmul.f32 1.442695, %v758_v41  ;;  %v769_v39 = vmul.f32 1.442695, %v757_v7  ;;  %v760_v46 = vsub.f32 %v683_v43, %v744_v31 }
 0x254   : > { %1267 = vpow2.f32 %v763_v50  ;;  %v773_v52 = vmul.f32 1.442695, %v759_v48 }
 0x255   : > { %1269 = vpow2.f32 %v761_v28  ;;  %v775_v49 = vmul.f32 1.442695, %v760_v46 }
 0x256   : > { %1271 = vpow2.f32 %v767_v33 }
 0x257   : > { %1273 = vpow2.f32 %v765_v35 }
 0x258   : > { %1275 = vpow2.f32 %v771_v19 }
 0x259   : > { %1277 = vpow2.f32 %v769_v39 }
 0x25a   : > { %v1599_v10 = vpop.eup %1267  ;;  %1279 = vpow2.f32 %v775_v49 }
 0x25b   : > { %v1601_v37 = vpop.eup %1269  ;;  %789 = vperm.xlu2 %1230, %v1599_v10   ;;  %1281 = vpow2.f32 %v773_v52 }
 0x25c   : > { %786 = vperm.xlu1 %1232, %v1601_v37   ;;  %v1607_v44 = vpop.eup %1271 }
 0x25d   : > { %v1609_v45 = vpop.eup %1273 }
 0x25e   : > { %v1614_v6 = vpop.eup %1275 }
 0x25f   : > { %v1616_v13 = vpop.eup %1277 }
 0x260   : > { %v1620_v53 = vpop.eup %1279 }
 0x261   : > { %v1622_v55 = vpop.eup %1281 }
 0x263   : > { %795 = vperm.xlu2 %1230, %v1607_v44  }
 0x264   : > { %792 = vperm.xlu1 %1232, %v1609_v45  }
 0x26b   : > { %801 = vperm.xlu2 %1230, %v1614_v6  }
 0x26c   : > { %798 = vperm.xlu1 %1232, %v1616_v13  }
 0x273   : > { %807 = vperm.xlu2 %1230, %v1620_v53  }
 0x274   : > { %804 = vperm.xlu1 %1232, %v1622_v55  }
 0x2b5   : > { %v790_v38 = vpop.permute.xlu2 %789 }
 0x2b6   : > { %v810_v61 = vperm.slane %v790_v38, %v1418_v3 }
 0x2bd   : > { %v796_v58 = vpop.permute.xlu2 %795 }
 0x2be   : > { %v812_v4 = vperm.slane %v796_v58, %v1418_v3 }
 0x2c5   : > { %v802_v40 = vpop.permute.xlu2 %801 }
 0x2c6   : > { %v814_v9 = vperm.slane %v802_v40, %v1418_v3 }
 0x2cd   : > { %v808_v5 = vpop.permute.xlu2 %807 }
 0x2ce   : > { %v787_v56 = vpop.permute.xlu1 %786  ;;  %v816_v12 = vperm.slane %v808_v5, %v1418_v3 }
 0x2cf   : > { %v809_v43 = vperm.slane %v787_v56, %v1418_v3 }
 0x2d1   : > { %v817_v63 = vsel %vm483_vm12, %v810_v61, %v809_v43 }
 0x2d6   : > { %v793_v59 = vpop.permute.xlu1 %792 }
 0x2d7   : > { %v811_v60 = vperm.slane %v793_v59, %v1418_v3 }
 0x2d9   : > { %v818_v0 = vsel %vm485_vm14, %v811_v60, %v817_v63 }
 0x2da   : > { %v819_v47 = vsel %vm487_vm15, %v812_v4, %v818_v0 }
 0x2de   : > { %v799_v62 = vpop.permute.xlu1 %798 }
 0x2df   : > { %v813_v2 = vperm.slane %v799_v62, %v1418_v3 }
 0x2e1   : > { %v820_v8 = vsel %vm489_vm4, %v813_v2, %v819_v47 }
 0x2e2   : > { %v821_v14 = vsel %vm491_vm8, %v814_v9, %v820_v8 }
 0x2e6   : > { %v805_v1 = vpop.permute.xlu1 %804 }
 0x2e7   : > { %v815_v11 = vperm.slane %v805_v1, %v1418_v3 }
 0x2e9   : > { %v822_v51 = vsel %vm493_vm9, %v815_v11, %v821_v14 }
 0x2ea   : > { %v823_v15 = vsel %vm1804_vm7, %v816_v12, %v822_v51 }
 0x2eb   : > { %v825_v16 = vsel %vm732_vm5, %v823_v15, 0.0 }
 0x2ec   : > { %826 = vadd.xlane.f32.xlu1 %v825_v16 }
 0x35f   : > { %v827_v17 = vpop.xlane.xlu1 %826 }
 0x360   : > { %v829_v21 = vperm.slane %v827_v17, 0  ;;  %v830_v22 = vperm.slane %v827_v17, 1  ;;  %v1642_v18 = vperm.slane %v827_v17, 2  ;;  %v1644_v54 = vperm.slane %v827_v17, 3 }
 0x361   : > { %v1646_v57 = vperm.slane %v827_v17, 4  ;;  %v1648_v3 = vperm.slane %v827_v17, 6  ;;  %v1653_v26 = vperm.slane %v827_v17, 5  ;;  %v1656_v29 = vperm.slane %v827_v17, 7 }
 0x362   : > { %1283 = vrcp.f32 %v829_v21  ;;  %v869_v23 = vand.u32 2147483647, %v830_v22  ;;  %v871_v24 = vand.u32 2147483648, %v830_v22  ;;  %v854_v20 = vand.u32 2147483647, %v829_v21 }
 0x363   : > { %1285 = vrcp.f32 %v830_v22  ;;  %vm865_vm0 = vweird.f32 %v830_v22  ;;  %vm850_vm1 = vweird.f32 %v829_v21  ;;  %v856_v32 = vand.u32 2147483648, %v829_v21 }
 0x364   : > { %1287 = vrcp.f32 %v1642_v18  ;;  %vm1662_vm11 = vcmp.eq.f32.partialorder %v869_v23, 8.507059e+37  ;;  %v872_v35 = vor.u32 1.1754944e-38, %v871_v24  ;;  %vm1669_vm10 = vcmp.eq.f32.partialorder %v854_v20, 8.507059e+37 }
 0x365   : > { %1289 = vrcp.f32 %v1644_v54  ;;  %v857_v38 = vor.u32 1.1754944e-38, %v856_v32  ;;  %v916_v56 = vand.u32 2147483648, %v1646_v57  ;;  %vm880_vm5 = vweird.f32 %v1642_v18 }
 0x366   : > { %1291 = vrcp.f32 %v1646_v57  ;;  %v886_v61 = vand.u32 2147483648, %v1642_v18  ;;  %v884_v12 = vand.u32 2147483647, %v1642_v18  ;;  %v914_v51 = vand.u32 2147483647, %v1646_v57 }
 0x367   : > { %1293 = vrcp.f32 %v1648_v3  ;;  %v944_v34 = vand.u32 2147483647, %v1648_v3 }
 0x368   : > { %v1284_v25 = vpop.eup %1283  ;;  %1295 = vrcp.f32 %v1653_v26  ;;  %v887_v17 = vor.u32 1.1754944e-38, %v886_v61 }
 0x369   : > { %v1286_v27 = vpop.eup %1285  ;;  %v846_v50 = vmul.f32 %v1284_v25, %v829_v21  ;;  %vm851_vm13 = vweird.f32 %v1284_v25  ;;  %1297 = vrcp.f32 %v1656_v29 }
 0x36a   : > { %v1658_v28 = vpop.eup %1287  ;;  %v861_v30 = vmul.f32 %v1286_v27, %v830_v22  ;;  %vm866_vm2 = vweird.f32 %v1286_v27  ;;  %vm852_vm3 = vmor %vm850_vm1, %vm851_vm13  ;;  %v917_v22 = vor.u32 1.1754944e-38, %v916_v56 }
 0x36b   : > { %v1660_v33 = vpop.eup %1289  ;;  %v847_v36 = vsub.f32 1.0, %v846_v50  ;;  %v876_v41 = vmul.f32 %v1658_v28, %v1642_v18  ;;  %vm881_vm6 = vweird.f32 %v1658_v28  ;;  %vm867_vm7 = vmor %vm865_vm0, %vm866_vm2  ;;  %vm910_vm0 = vweird.f32 %v1646_v57 }
 0x36c   : > { %v1292_v7 = vpop.eup %1291  ;;  %v862_v19 = vsub.f32 1.0, %v861_v30  ;;  %v891_v48 = vmul.f32 %v1660_v33, %v1644_v54  ;;  %vm882_vm13 = vmor %vm880_vm5, %vm881_vm6  ;;  %vm915_vm2 = vcmp.eq.f32.partialorder %v914_v51, 8.507059e+37  ;;  %vm895_vm6 = vweird.f32 %v1644_v54 }
 0x36d   : > { %v848_v39 = vmul.f32 %v1284_v25, %v847_v36  ;;  %v906_v42 = vmul.f32 %v1292_v7, %v1646_v57  ;;  %v877_v46 = vsub.f32 1.0, %v876_v41  ;;  %v1676_v49 = vpop.eup %1293  ;;  %vm911_vm1 = vweird.f32 %v1292_v7 }
 0x36e   : > { %v863_v52 = vmul.f32 %v1286_v27, %v862_v19  ;;  %v936_v43 = vmul.f32 %v1676_v49, %v1648_v3  ;;  %v892_v2 = vsub.f32 1.0, %v891_v48  ;;  %v1689_v4 = vpop.eup %1295  ;;  %vm941_vm5 = vweird.f32 %v1676_v49 }
 0x36f   : > { %v849_v58 = vadd.f32 %v1284_v25, %v848_v39  ;;  %v907_v59 = vsub.f32 1.0, %v906_v42  ;;  %v878_v40 = vmul.f32 %v1658_v28, %v877_v46  ;;  %v921_v16 = vmul.f32 %v1689_v4, %v1653_v26 }
 0x370   : > { %v864_v60 = vadd.f32 %v1286_v27, %v863_v52  ;;  %v937_v8 = vsub.f32 1.0, %v936_v43  ;;  %v893_v15 = vmul.f32 %v1660_v33, %v892_v2  ;;  %v899_v30 = vand.u32 2147483647, %v1644_v54 }
 0x371   : > { %v853_v62 = vsel %vm852_vm3, %v1284_v25, %v849_v58  ;;  %v908_v63 = vmul.f32 %v1292_v7, %v907_v59  ;;  %v879_v0 = vadd.f32 %v1658_v28, %v878_v40  ;;  %vm896_vm3 = vweird.f32 %v1660_v33  ;;  %v1298_v25 = vpop.eup %1297 }
 0x372   : > { %v868_v47 = vsel %vm867_vm7, %v1286_v27, %v864_v60  ;;  %v858_v5 = vsel %vm1669_vm10, %v857_v38, %v853_v62  ;;  %v938_v21 = vmul.f32 %v1676_v49, %v937_v8  ;;  %vm885_vm10 = vcmp.eq.f32.partialorder %v884_v12, 8.507059e+37 }
 0x373   : > { %v873_v9 = vsel %vm1662_vm11, %v872_v35, %v868_v47  ;;  %v859_v1 = vmul.f32 %v1601_v37, %v858_v5  ;;  %v909_v11 = vadd.f32 %v1292_v7, %v908_v63  ;;  %vm912_vm11 = vmor %vm910_vm0, %vm911_vm1  ;;  %v883_v37 = vsel %vm882_vm13, %v1658_v28, %v879_v0  ;;  %v248_v63 = vld [vmem:[%s1744_s28 + $0x8] sm:$0xf]  ;;  %v247_v47 = vld [vmem:[%s1744_s28 + $0x4] sm:$0xf] }
 0x374   : > { %v874_v14 = vmul.f32 %v1599_v10, %v873_v9  ;;  %v888_v57 = vsel %vm885_vm10, %v887_v17, %v883_v37  ;;  %v894_v23 = vadd.f32 %v1660_v33, %v893_v15  ;;  %v922_v24 = vsub.f32 1.0, %v921_v16  ;;  %vm897_vm1 = vmor %vm895_vm6, %vm896_vm3  ;;  %v1072_v5 = vld [vmem:[%s1798_s3 + $0x18] sm:$0xff] }
 0x375   : > { %967 = vperm.xlu2 %1230, %v859_v1   ;;  %v913_v10 = vsel %vm912_vm11, %v1292_v7, %v909_v11  ;;  %v939_v20 = vadd.f32 %v1676_v49, %v938_v21  ;;  %v901_v27 = vand.u32 2147483648, %v1644_v54  ;;  %v889_v50 = vmul.f32 %v1609_v45, %v888_v57  ;;  %v251_v1 = vld [vmem:[%s1744_s28 + $0x14] sm:$0xf] }
 0x376   : > { %972 = vperm.xlu0 %1231, %v874_v14   ;;  %v918_v18 = vsel %vm915_vm2, %v917_v22, %v913_v10  ;;  %v946_v28 = vand.u32 2147483648, %v1648_v3  ;;  %vm940_vm7 = vweird.f32 %v1648_v3  ;;  %v898_v35 = vsel %vm897_vm1, %v1660_v33, %v894_v23  ;;  %v1071_v14 = vld [vmem:[%s1798_s3 + $0x10] sm:$0xff]  ;;  %v1070_v22 = vld [vmem:[%s1798_s3 + $0x8] sm:$0xff] }
 0x377   : > { %v919_v32 = vmul.f32 %v1616_v13, %v918_v18  ;;  %vm942_vm0 = vmor %vm940_vm7, %vm941_vm5  ;;  %v923_v36 = vmul.f32 %v1689_v4, %v922_v24  ;;  %v951_v45 = vmul.f32 %v1298_v25, %v1656_v29  ;;  %v902_v7 = vor.u32 1.1754944e-38, %v901_v27  ;;  %v253_v18 = vld [vmem:[%s1744_s28 + $0x1c] sm:$0xf] }
 0x378   : > { %v943_v41 = vsel %vm942_vm0, %v1676_v49, %v939_v20  ;;  %v947_v54 = vor.u32 1.1754944e-38, %v946_v28  ;;  %vm900_vm13 = vcmp.eq.f32.partialorder %v899_v30, 8.507059e+37  ;;  %vm945_vm11 = vcmp.eq.f32.partialorder %v944_v34, 8.507059e+37  ;;  %v250_v20 = vld [vmem:[%s1744_s28 + $0x10] sm:$0xf]  ;;  %v1069_v34 = vld [vmem:[%s1798_s3] sm:$0xff] }
 0x379   : > { %v903_v13 = vsel %vm900_vm13, %v902_v7, %v898_v35  ;;  %v924_v3 = vadd.f32 %v1689_v4, %v923_v36  ;;  %vm926_vm10 = vweird.f32 %v1689_v4  ;;  %v952_v31 = vsub.f32 1.0, %v951_v45 }
 0x37a   : > { %v948_v19 = vsel %vm945_vm11, %v947_v54, %v943_v41  ;;  %v931_v33 = vand.u32 2147483648, %v1653_v26  ;;  %v904_v39 = vmul.f32 %v1607_v44, %v903_v13  ;;  %vm925_vm2 = vweird.f32 %v1653_v26 }
 0x37b   : > { %v929_v42 = vand.u32 2147483647, %v1653_v26  ;;  %v949_v46 = vmul.f32 %v1622_v55, %v948_v19  ;;  %vm927_vm3 = vmor %vm925_vm2, %vm926_vm10  ;;  %v953_v49 = vmul.f32 %v1298_v25, %v952_v31  ;;  %vm956_vm6 = vweird.f32 %v1298_v25 }
 0x37c   : > { %v928_v48 = vsel %vm927_vm3, %v1689_v4, %v924_v3  ;;  %v932_v52 = vor.u32 1.1754944e-38, %v931_v33  ;;  %v961_v44 = vand.u32 2147483648, %v1656_v29  ;;  %vm955_vm7 = vweird.f32 %v1656_v29 }
 0x37d   : > { %977 = vperm.xlu2 %1230, %v889_v50   ;;  %vm930_vm5 = vcmp.eq.f32.partialorder %v929_v42, 8.507059e+37  ;;  %v954_v56 = vadd.f32 %v1298_v25, %v953_v49  ;;  %v959_v55 = vand.u32 2147483647, %v1656_v29  ;;  %vm957_vm1 = vmor %vm955_vm7, %vm956_vm6  ;;  %vm1809_vm13 = vcmask 257024   ;;  %v252_v49 = vld [vmem:[%s1744_s28 + $0x18] sm:$0xf] }
 0x37e   : > { %987 = vperm.xlu0 %1231, %v919_v32   ;;  %v933_v38 = vsel %vm930_vm5, %v932_v52, %v928_v48  ;;  %v962_v59 = vor.u32 1.1754944e-38, %v961_v44  ;;  %vm1810_vm11 = vmmov %vm1809_vm13  ;;  %vm1811_vm10 = vcmask 261120  }
 0x37f   : > { %v934_v58 = vmul.f32 %v1614_v6, %v933_v38  ;;  %v958_v26 = vsel %vm957_vm1, %v1298_v25, %v954_v56  ;;  %vm960_vm0 = vcmp.eq.f32.partialorder %v959_v55, 8.507059e+37  ;;  %v246_v6 = vld [vmem:[%s1744_s28] sm:$0xf]  ;;  %1211 = vmatpush.xpose.msk.msra.mxu0 %vm1811_vm10, %v1072_v5  ;;  %vm1812_vm2 = vmmov %vm1810_vm11 }
 0x380   : > { %v963_v40 = vsel %vm960_vm0, %v962_v59, %v958_v26  ;;  %vm1813_vm3 = vmmov %vm1812_vm2 }
 0x381   : > { %v964_v43 = vmul.f32 %v1620_v53, %v963_v40  ;;  %v249_v53 = vld [vmem:[%s1744_s28 + $0xc] sm:$0xf]  ;;  %vm1814_vm5 = vmmov %vm1811_vm10 }
 0x382   : > { %vm1815_vm6 = vmmov %vm1812_vm2 }
 0x383   : > { %1212 = vmatpush.xpose.msk.msra.mxu0 %vm1814_vm5, %v1071_v14  ;;  %vm1816_vm7 = vmmov %vm1814_vm5 }
 0x384   : > { %vm1817_vm1 = vmmov %vm1812_vm2 }
 0x385   : > { %982 = vperm.xlu2 %1230, %v904_v39   ;;  %vm1818_vm0 = vmmov %vm1817_vm1 }
 0x386   : > { %997 = vperm.xlu0 %1231, %v949_v46   ;;  %vm1822_vm10 = vmmov %vm1814_vm5 }
 0x387   : > { %1213 = vmatpush.xpose.msk.msra.mxu0 %vm1816_vm7, %v1070_v22 }
 0x38d   : > { %992 = vperm.xlu2 %1230, %v934_v58  }
 0x395   : > { %1002 = vperm.xlu2 %1230, %v964_v43  }
 0x3cf   : > { %v968_v60 = vpop.permute.xlu2 %967 }
 0x3d0   : > { %v1005_v62 = vmul.f32 %v968_v60, %v246_v6 }
 0x3d2   : > { %v1013_v2 = vsel %vm1809_vm13, %v1005_v62, 0.0  ;;  %vm1819_vm13 = vmmov %vm1814_vm5 }
 0x3d3   : > { %v1014_v8 = vrot.slane %v1013_v2, 4  ;;  %1214 = vmatpush.xpose.msk.msra.mxu0 %vm1819_vm13, %v1069_v34 }
 0x3d5   : > { %v1015_v10 = vadd.f32 %v1014_v8, %v1013_v2 }
 0x3d7   : > { %v978_v61 = vpop.permute.xlu2 %977  ;;  %v1016_v27 = vrot.slane %v1015_v10, 2 }
 0x3d8   : > { %v1007_v0 = vmul.f32 %v978_v61, %v248_v63 }
 0x3d9   : > { %v1017_v13 = vadd.f32 %v1016_v27, %v1015_v10 }
 0x3da   : > { %v1027_v9 = vsel %vm1810_vm11, %v1007_v0, 0.0  ;;  %vm1820_vm11 = vmmov %vm1818_vm0 }
 0x3db   : > { %v1028_v37 = vrot.slane %v1027_v9, 4  ;;  %v1018_v52 = vrot.slane %v1017_v13, 1 }
 0x3dd   : > { %v1029_v23 = vadd.f32 %v1028_v37, %v1027_v9  ;;  %v1019_v60 = vadd.f32 %v1018_v52, %v1017_v13 }
 0x3df   : > { %v983_v29 = vpop.permute.xlu2 %982  ;;  %v1030_v41 = vrot.slane %v1029_v23, 2 }
 0x3e0   : > { %v1008_v4 = vmul.f32 %v983_v29, %v249_v53 }
 0x3e1   : > { %v1031_v46 = vadd.f32 %v1030_v41, %v1029_v23 }
 0x3e2   : > { %v1034_v15 = vsel %vm1812_vm2, %v1008_v4, 0.0 }
 0x3e3   : > { %v1035_v57 = vrot.slane %v1034_v15, 4  ;;  %v1032_v40 = vrot.slane %v1031_v46, 1 }
 0x3e5   : > { %v1036_v35 = vadd.f32 %v1035_v57, %v1034_v15  ;;  %v1033_v2 = vadd.f32 %v1032_v40, %v1031_v46 }
 0x3e7   : > { %v993_v11 = vpop.permute.xlu2 %992  ;;  %v1037_v33 = vrot.slane %v1036_v35, 2 }
 0x3e8   : > { %v973_v12 = vpop.permute.xlu0 %972  ;;  %v1010_v16 = vmul.f32 %v993_v11, %v251_v1 }
 0x3e9   : > { %v1006_v51 = vmul.f32 %v973_v12, %v247_v47  ;;  %v1038_v58 = vadd.f32 %v1037_v33, %v1036_v35 }
 0x3ea   : > { %v1048_v25 = vsel %vm1815_vm6, %v1010_v16, 0.0 }
 0x3eb   : > { %v1020_v17 = vsel %vm1813_vm3, %v1006_v51, 0.0  ;;  %v1049_v36 = vrot.slane %v1048_v25, 4  ;;  %v1039_v63 = vrot.slane %v1038_v58, 1 }
 0x3ec   : > { %v1021_v21 = vrot.slane %v1020_v17, 4 }
 0x3ed   : > { %v1050_v42 = vadd.f32 %v1049_v36, %v1048_v25  ;;  %v1040_v1 = vadd.f32 %v1039_v63, %v1038_v58 }
 0x3ee   : > { %v1022_v24 = vadd.f32 %v1021_v21, %v1020_v17 }
 0x3ef   : > { %v1003_v50 = vpop.permute.xlu2 %1002  ;;  %v1051_v26 = vrot.slane %v1050_v42, 2 }
 0x3f0   : > { %v1023_v28 = vrot.slane %v1022_v24, 2  ;;  %v988_v30 = vpop.permute.xlu0 %987  ;;  %v1012_v32 = vmul.f32 %v1003_v50, %v253_v18 }
 0x3f1   : > { %v1009_v45 = vmul.f32 %v988_v30, %v250_v20  ;;  %v1052_v53 = vadd.f32 %v1051_v26, %v1050_v42 }
 0x3f2   : > { %v1024_v7 = vadd.f32 %v1023_v28, %v1022_v24  ;;  %v1062_v54 = vsel %vm1817_vm1, %v1012_v32, 0.0 }
 0x3f3   : > { %v1041_v19 = vsel %vm1818_vm0, %v1009_v45, 0.0  ;;  %v1063_v3 = vrot.slane %v1062_v54, 4  ;;  %v1053_v11 = vrot.slane %v1052_v53, 1 }
 0x3f4   : > { %v1042_v31 = vrot.slane %v1041_v19, 4  ;;  %v1025_v39 = vrot.slane %v1024_v7, 1 }
 0x3f5   : > { %v1064_v38 = vadd.f32 %v1063_v3, %v1062_v54  ;;  %v1054_v16 = vadd.f32 %v1053_v11, %v1052_v53 }
 0x3f6   : > { %v1043_v48 = vadd.f32 %v1042_v31, %v1041_v19  ;;  %v1026_v55 = vadd.f32 %v1025_v39, %v1024_v7 }
 0x3f7   : > { %v1065_v61 = vrot.slane %v1064_v38, 2 }
 0x3f8   : > { %v1044_v56 = vrot.slane %v1043_v48, 2  ;;  %v998_v44 = vpop.permute.xlu0 %997  ;;  %v1081_v0 = vsel %vm483_vm12, %v1026_v55, %v1019_v60  ;;  %vm1821_vm12 = vcmask 1047559  }
 0x3f9   : > { %v1011_v59 = vmul.f32 %v998_v44, %v252_v49  ;;  %v1066_v47 = vadd.f32 %v1065_v61, %v1064_v38  ;;  %v1082_v9 = vsel %vm485_vm14, %v1033_v2, %v1081_v0  ;;  %vm1823_vm14 = vmmov %vm1814_vm5 }
 0x3fa   : > { %v1045_v43 = vadd.f32 %v1044_v56, %v1043_v48  ;;  %v1083_v51 = vsel %vm487_vm15, %v1040_v1, %v1082_v9 }
 0x3fb   : > { %v1055_v6 = vsel %vm1820_vm11, %v1011_v59, 0.0  ;;  %v1067_v14 = vrot.slane %v1066_v47, 1 }
 0x3fc   : > { %v1046_v29 = vrot.slane %v1045_v43, 1  ;;  %v1056_v62 = vrot.slane %v1055_v6, 4 }
 0x3fd   : > { %v1068_v17 = vadd.f32 %v1067_v14, %v1066_v47 }
 0x3fe   : > { %v1057_v4 = vadd.f32 %v1056_v62, %v1055_v6  ;;  %v1047_v5 = vadd.f32 %v1046_v29, %v1045_v43 }
 0x400   : > { %v1058_v8 = vrot.slane %v1057_v4, 2  ;;  %v1084_v15 = vsel %vm489_vm4, %v1047_v5, %v1083_v51 }
 0x401   : > { %v1085_v21 = vsel %vm491_vm8, %v1054_v16, %v1084_v15 }
 0x402   : > { %v1059_v12 = vadd.f32 %v1058_v8, %v1057_v4 }
 0x404   : > { %v1060_v37 = vrot.slane %v1059_v12, 1 }
 0x406   : > { %v1061_v10 = vadd.f32 %v1060_v37, %v1059_v12 }
 0x408   : > { %v1086_v22 = vsel %vm493_vm9, %v1061_v10, %v1085_v21 }
 0x409   : > { %v1087_v57 = vsel %vm1821_vm12, %v1068_v17, %v1086_v22 }
 0x40a   : > { %1215 = vmatmul.msk.f32.vlgmr.msra.gmra.mxu0 %vm1822_vm10, %v1087_v57 }
 0x487   : > { %v1119_v18 = vpop.f32.mrf.mxu0 }
 0x488   : > { %1122 = vst.msk [vmem:[%s236_s13] sm:$0xff] %vm1823_vm14, %v1119_v18 }
 0x489 PF: > { %s14_s15 = sadd.s32 1, %s1305_s15  }
 0x48a   : > { %p11_p5 = scmp.ge.s32.totalorder %s14_s15, 4  }
 0x48c   :  { %13 = sbr.rel (!%p11_p5) target bundleno = 1 (0x1), region = 72 }

</bundles_post_ra>
